<compile_context>
chip_gen: v7x
topology: tpu7x:2x2x1
jax: 0.10.0
libtpu: 0.0.40
codegen_flags: <defaults>
</compile_context>

<pallas_src>
import functools

import jax
import jax.numpy as jnp
from jax.experimental import pallas as pl
from jax.experimental.pallas import tpu as pltpu

SEQ = 2       # input features  (torch: Linear(seq, 15))
HIDDEN = 15   # hidden features
HID_PAD = 16  # padded hidden (2 full f32 sublane groups)
OUT = 1       # output features
OUT_PAD = 8   # padded layer-2 output rows (1 sublane group) for the MXU


def mlp_kernel(x_ref, w1_ref, b1_ref, w2t_ref, b2_ref, o_ref):
    # x_ref  : (SEQ, Bt)          batch on the lane axis
    # w1_ref : (HID_PAD, SEQ)     torch (out, in) layout, zero-padded rows
    # b1_ref : (HID_PAD, 1)       zero-padded
    # w2t_ref: (OUT_PAD, HID_PAD) torch w2, zero-padded rows/cols
    # b2_ref : (1, 1)             SMEM scalar
    # o_ref  : (OUT, Bt)
    x = x_ref[...]

    # Layer 1 on the MXU: (HID_PAD, SEQ) @ (SEQ, Bt).  f32 multi-pass keeps
    # ~f32 accuracy; the MXU is otherwise idle so the K=2 padding waste is free.
    h = jnp.dot(w1_ref[...], x,
                preferred_element_type=jnp.float32,
                precision=jax.lax.Precision.HIGHEST) + b1_ref[...]

    # Tanhshrink: x - tanh(x).  tanh -> EUP (the binding unit after the MXU
    # offload), subtract -> VPU.
    h = h - jnp.tanh(h)

    # Layer 2 on the MXU: (OUT_PAD, HID_PAD) @ (HID_PAD, Bt); keep row 0.
    y = jnp.dot(w2t_ref[...], h,
                preferred_element_type=jnp.float32,
                precision=jax.lax.Precision.HIGHEST)
    o_ref[...] = (y[:OUT, :] + b2_ref[0, 0]).astype(o_ref.dtype)


def _pick_b_tile(batch, requested):
    """Trace-time batch-tile choice: multiple of 128, <= padded batch, and
    >= 2 grid steps when the batch allows (so both v7x TensorCores get work)."""
    bt = max(128, (int(requested) // 128) * 128)
    b128 = pl.cdiv(batch, 128) * 128
    bt = min(bt, b128)
    if b128 >= 256 and bt > b128 // 2:
        bt = max(128, ((b128 // 2) // 128) * 128)
    return bt


@functools.partial(jax.jit, static_argnames=("b_tile",))
def net_forward_feature_major(xt, w1p, b1p, w2tp, b2p, *, b_tile=65536):
    """xt: (SEQ, B) f32 (feature-major) -> (OUT, B) f32.

    Preferred entry point: no transpose, the kernel streams x straight from
    its HBM layout (one read of x + one write of y = the HBM floor).
    """
    seq, B = xt.shape
    assert seq == SEQ, xt.shape

    bt = _pick_b_tile(B, b_tile)
    n_tiles = pl.cdiv(B, bt)
    Bp = n_tiles * bt
    if Bp != B:
        xt = jnp.pad(xt, ((0, 0), (0, Bp - B)))

    # I/O blocks are sublane-padded (2->8, 1->8); budget VMEM for that and the
    # in-kernel (HID_PAD, Bt) temporaries, capped below v7x's 64 MiB physical.
    vmem_limit = int(min(64 * 1024 * 1024, max(32 * 1024 * 1024, 640 * bt)))

    out_t = pl.pallas_call(
        mlp_kernel,
        out_shape=jax.ShapeDtypeStruct((OUT, Bp), xt.dtype),
        grid=(n_tiles,),
        in_specs=[
            # batch-tiled input (lane-dense)
            pl.BlockSpec((SEQ, bt), lambda i: (0, i)),
            # weights/biases: constant block index -> stay resident in VMEM
            pl.BlockSpec((HID_PAD, SEQ), lambda i: (0, 0)),
            pl.BlockSpec((HID_PAD, 1), lambda i: (0, 0)),
            pl.BlockSpec((OUT_PAD, HID_PAD), lambda i: (0, 0)),
            # scalar bias via SMEM (no padded VMEM tile)
            pl.BlockSpec(memory_space=pltpu.SMEM),
        ],
        out_specs=pl.BlockSpec((OUT, bt), lambda i: (0, i)),
        compiler_params=pltpu.CompilerParams(
            # mem/EUP-bound stream: shard batch tiles across TensorCores on
            # v7x; harmless (single TC) on v5e/v6e.
            dimension_semantics=("parallel",),
            vmem_limit_bytes=vmem_limit,
        ),
    )(xt, w1p, b1p, w2tp, b2p)

    return out_t[:, :B]  # (OUT, B)


def net_forward(x, w1p, b1p, w2tp, b2p, *, b_tile=65536):
    """x: (B, SEQ) f32 (torch layout) -> (B, OUT) f32.

    Convenience wrapper matching the torch module's calling convention.  The
    x.T here costs one extra HBM pass over the input; latency-critical callers
    should produce x feature-major and call net_forward_feature_major directly.
    """
    out_t = net_forward_feature_major(x.T, w1p, b1p, w2tp, b2p, b_tile=b_tile)
    return out_t.T  # (B, OUT); transposing a (1, B) slab is effectively a reshape


def init_params(key):
    """torch.nn.Linear-style init (uniform +/- 1/sqrt(fan_in)), torch layouts."""
    k1, k2, k3, k4 = jax.random.split(key, 4)
    bound1 = 1.0 / jnp.sqrt(SEQ)
    bound2 = 1.0 / jnp.sqrt(HIDDEN)
    w1 = jax.random.uniform(k1, (HIDDEN, SEQ), jnp.float32, -bound1, bound1)  # (out, in)
    b1 = jax.random.uniform(k2, (HIDDEN,), jnp.float32, -bound1, bound1)
    w2 = jax.random.uniform(k3, (OUT, HIDDEN), jnp.float32, -bound2, bound2)  # (out, in)
    b2 = jax.random.uniform(k4, (OUT,), jnp.float32, -bound2, bound2)
    return w1, b1, w2, b2


def pack_params(w1, b1, w2, b2):
    """Zero-pad HIDDEN -> HID_PAD / OUT -> OUT_PAD into the kernel layouts."""
    w1p = jnp.zeros((HID_PAD, SEQ), jnp.float32).at[:HIDDEN, :].set(w1)
    b1p = jnp.zeros((HID_PAD, 1), jnp.float32).at[:HIDDEN, 0].set(b1)
    w2tp = jnp.zeros((OUT_PAD, HID_PAD), jnp.float32).at[:OUT, :HIDDEN].set(w2)
    b2p = b2.reshape(1, 1).astype(jnp.float32)
    return w1p, b1p, w2tp, b2p


def reference_forward(x, w1, b1, w2, b2):
    # Exact f32 elementwise reference (no MXU / precision ambiguity).
    h = (x[:, None, :] * w1[None, :, :]).sum(-1) + b1
    h = h - jnp.tanh(h)
    return (h[:, None, :] * w2[None, :, :]).sum(-1) + b2


if __name__ == "__main__":
    key = jax.random.PRNGKey(0)
    kx, kp = jax.random.split(key)

    B = 8  # small demo batch (kernel handles any B; batch is padded to a tile)
    x = jax.random.normal(kx, (B, SEQ), jnp.float32)
    w1, b1, w2, b2 = init_params(kp)
    w1p, b1p, w2tp, b2p = pack_params(w1, b1, w2, b2)

    out = net_forward(x, w1p, b1p, w2tp, b2p)
    out = jax.block_until_ready(out)

    ref = reference_forward(x, w1, b1, w2, b2)
    assert out.shape == (B, OUT), out.shape
    assert jnp.allclose(out, ref, atol=5e-5, rtol=5e-5), (out, ref)

    print("KERNEL_OK")
</pallas_src>

<mosaic_0001>
module attributes {stable_mosaic.version = 11 : i64} {
  func.func @mlp_kernel(%arg0: i32, %arg1: memref<2x128xf32, #tpu.memory_space<vmem>>, %arg2: memref<16x2xf32, #tpu.memory_space<vmem>>, %arg3: memref<16x1xf32, #tpu.memory_space<vmem>>, %arg4: memref<8x16xf32, #tpu.memory_space<vmem>>, %arg5: memref<1x1xf32, #tpu.memory_space<smem>>, %arg6: memref<1x128xf32, #tpu.memory_space<vmem>>) attributes {dimension_semantics = [#tpu.dimension_semantics<parallel>], iteration_bounds = array<i64: 1>, scalar_prefetch = 0 : i64, scratch_operands = 0 : i64, tpu.core_type = #tpu.core_type<tc>, window_params = [{transform_indices = @transform_0, window_bounds = array<i64: 2, 128>}, {pipeline_mode = #tpu.pipeline_mode<synchronous>, transform_indices = @transform_1, window_bounds = array<i64: 16, 2>}, {pipeline_mode = #tpu.pipeline_mode<synchronous>, transform_indices = @transform_2, window_bounds = array<i64: 16, 1>}, {pipeline_mode = #tpu.pipeline_mode<synchronous>, transform_indices = @transform_3, window_bounds = array<i64: 8, 16>}, {transform_indices = @transform_4, window_bounds = array<i64: 1, 1>}, {transform_indices = @transform_5, window_bounds = array<i64: 1, 128>}]} {
    %c0 = arith.constant 0 : index
    %c0_0 = arith.constant 0 : index
    %0 = vector.load %arg1[%c0, %c0_0] : memref<2x128xf32, #tpu.memory_space<vmem>>, vector<2x128xf32>
    %c0_1 = arith.constant 0 : index
    %c0_2 = arith.constant 0 : index
    %1 = vector.load %arg2[%c0_1, %c0_2] : memref<16x2xf32, #tpu.memory_space<vmem>>, vector<16x2xf32>
    %cst = arith.constant dense<0.000000e+00> : vector<16x128xf32>
    %2 = tpu.matmul %1, %0, %cst {dimension_numbers = #tpu.dot_dimension_numbers<[1], [0], [0], [1], [0, 0, 1, 1], [], []>, precision = #tpu.contract_precision<fp32>} : vector<16x2xf32>, vector<2x128xf32>, vector<16x128xf32> -> vector<16x128xf32>
    %c0_3 = arith.constant 0 : index
    %c0_4 = arith.constant 0 : index
    %3 = vector.load %arg3[%c0_3, %c0_4] : memref<16x1xf32, #tpu.memory_space<vmem>>, vector<16x1xf32>
    %4 = vector.broadcast %3 : vector<16x1xf32> to vector<16x128xf32>
    %5 = arith.addf %2, %4 : vector<16x128xf32>
    %6 = math.tanh %5 : vector<16x128xf32>
    %7 = arith.subf %5, %6 : vector<16x128xf32>
    %c0_5 = arith.constant 0 : index
    %c0_6 = arith.constant 0 : index
    %8 = vector.load %arg4[%c0_5, %c0_6] : memref<8x16xf32, #tpu.memory_space<vmem>>, vector<8x16xf32>
    %cst_7 = arith.constant dense<0.000000e+00> : vector<8x128xf32>
    %9 = tpu.matmul %8, %7, %cst_7 {dimension_numbers = #tpu.dot_dimension_numbers<[1], [0], [0], [1], [0, 0, 1, 1], [], []>, precision = #tpu.contract_precision<fp32>} : vector<8x16xf32>, vector<16x128xf32>, vector<8x128xf32> -> vector<8x128xf32>
    %10 = vector.extract_strided_slice %9 {offsets = [0, 0], sizes = [1, 128], strides = [1, 1]} : vector<8x128xf32> to vector<1x128xf32>
    %c0_8 = arith.constant 0 : index
    %c0_9 = arith.constant 0 : index
    %11 = memref.load %arg5[%c0_8, %c0_9] : memref<1x1xf32, #tpu.memory_space<smem>>
    %12 = vector.broadcast %11 : f32 to vector<1x128xf32>
    %13 = arith.addf %10, %12 : vector<1x128xf32>
    %c0_10 = arith.constant 0 : index
    %c0_11 = arith.constant 0 : index
    %14 = vector.load %arg6[%c0_10, %c0_11] : memref<1x128xf32, #tpu.memory_space<vmem>>, vector<1x128xf32>
    tpu.vector_store %arg6[%c0_10, %c0_11], %13 {strides = array<i32>} : memref<1x128xf32, #tpu.memory_space<vmem>>, vector<1x128xf32>,
    return
  }
  func.func @transform_0(%arg0: i32) -> (i32, i32) {
    %c0_i32 = arith.constant 0 : i32
    %c0_i32_0 = arith.constant 0 : i32
    return %c0_i32, %arg0 : i32, i32
  }
  func.func @transform_1(%arg0: i32) -> (i32, i32) {
    %c0_i32 = arith.constant 0 : i32
    %c0_i32_0 = arith.constant 0 : i32
    %c0_i32_1 = arith.constant 0 : i32
    return %c0_i32, %c0_i32_0 : i32, i32
  }
  func.func @transform_2(%arg0: i32) -> (i32, i32) {
    %c0_i32 = arith.constant 0 : i32
    %c0_i32_0 = arith.constant 0 : i32
    %c0_i32_1 = arith.constant 0 : i32
    return %c0_i32, %c0_i32_0 : i32, i32
  }
  func.func @transform_3(%arg0: i32) -> (i32, i32) {
    %c0_i32 = arith.constant 0 : i32
    %c0_i32_0 = arith.constant 0 : i32
    %c0_i32_1 = arith.constant 0 : i32
    return %c0_i32, %c0_i32_0 : i32, i32
  }
  func.func @transform_4(%arg0: i32) -> (i32, i32) {
    %c0_i32 = arith.constant 0 : i32
    %c0_i32_0 = arith.constant 0 : i32
    %c0_i32_1 = arith.constant 0 : i32
    return %c0_i32, %c0_i32_0 : i32, i32
  }
  func.func @transform_5(%arg0: i32) -> (i32, i32) {
    %c0_i32 = arith.constant 0 : i32
    %c0_i32_0 = arith.constant 0 : i32
    return %c0_i32, %arg0 : i32, i32
  }
}

</mosaic_0001>

<bundles_post_ra>
// kernel: net_forward_feature_major.1
= control target key start
LH: loop header
LB: loop body
LE: loop exit
PB: predicated region body
PF: predicated region fallthrough
CT: control target
= control target key end

     0   :  { %vm44_vm0 = vcmask 1041408   ;;  %vm37_vm1 = vcmask 15360   ;;  %v1195_v10 = vmov 0   ;;  %s1269_s0 = inlined_call_operand.vmem [shape: f32[2,128], index: 0, kind: input, shape index: {}]   ;;  %s1270_s1 = inlined_call_operand.vmem [shape: f32[16,2], index: 1, kind: input, shape index: {}]   ;;  %s1271_s2 = inlined_call_operand.vmem [shape: f32[16,1], index: 2, kind: input, shape index: {}]   ;;  %s1272_s3 = inlined_call_operand.vmem [shape: f32[8,16], index: 3, kind: input, shape index: {}]   ;;  %s1273_s4 = inlined_call_operand.<no memory space> [shape: f32[1,1], index: 4, kind: input, shape index: {}]   ;;  %s1274_s5 = inlined_call_operand.hbm [shape: f32[1,128], index: 5, kind: output, shape index: {}]  }
   0x1   :  { %v22_v0 = vld [vmem:[%s1269_s0] sm:$0x3]  ;;  %v24_v2 = vld [vmem:[%s1270_s1 + $0x8] sm:$0xff]  ;;  %1166 = vset.pattern.permute.xlu0 %v1195_v10 }
   0x2   :  { %v23_v1 = vld [vmem:[%s1270_s1] sm:$0xff]  ;;  %v46_v3 = vsel %vm44_vm0, %v22_v0, 0  ;;  %v42_v5 = vsel %vm37_vm1, %v24_v2, 0 }
   0x3   :  { %v39_v4 = vsel %vm37_vm1, %v23_v1, 0  ;;  %v25_v6 = vld [vmem:[%s1271_s2] sm:$0xff]  ;;  %v49_v7 = vand.u32 4294901760, %v46_v3  ;;  %v124_v9 = vand.u32 4294901760, %v42_v5 }
   0x4   :  { %v114_v8 = vand.u32 4294901760, %v39_v4 }
   0x5   :  { %11 = vsyncpa [#allocation4], 0  ;;  %29 = vperm.xlu0 %1166, %v25_v6   ;;  %1059 = vmatprep.subr.mxu0 %v49_v7  ;;  %v125_v12 = vsub.f32 %v42_v5, %v124_v9  ;;  %v136_v13 = vsub.f32 %v46_v3, %v49_v7  ;;  %v26_v14 = vld [vmem:[%s1271_s2 + $0x8] sm:$0xff]  ;;  %v1196_v24 = vmov 0.0|0.0   ;;  %vm1197_vm2 = vmmov 0   ;;  %v541_v27 = vld [vmem:[%s1272_s3] sm:$0xff] }
   0x6   :  { %v115_v11 = vsub.f32 %v39_v4, %v114_v8  ;;  %1060 = vmatpush3.msra.mxu0 %v49_v7  ;;  %1131 = vmatprep.subr.bf16.mxu1 %v1196_v24  ;;  %v1198_v25 = vmov 0.0   ;;  %vm542_vm3 = vcmask 130048   ;;  %s1199_s28 = smov [#allocation3]  }
   0x7   :  { %v126_v16 = vand.u32 4294901760, %v125_v12  ;;  %v137_v17 = vand.u32 4294901760, %v136_v13  ;;  %1093 = vmatprep.mubr.msk.f32.mxu1 %vm1197_vm2, %v1198_v25  ;;  %v544_v32 = vsel %vm542_vm3, %v541_v27, 0  ;;  %s1015_s29 = sshll.u32 %s1199_s28, 4  ;;  %s1016_s29 = int_to_ptr.vmem [resolvable:$true] %s1015_s29 }
   0x8   :  { %v116_v15 = vand.u32 4294901760, %v115_v11  ;;  %v613_v34 = vand.u32 4294901760, %v544_v32  ;;  %s1171_s30 = scalar_lea.vmem %s1016_s29, 16  ;;  %s1175_s6 = scalar_lea.vmem %s1016_s29, 32 }
   0x9   :  { %34 = vperm.xlu0 %1166, %v26_v14   ;;  %v127_v19 = vsub.f32 %v125_v12, %v126_v16  ;;  %v138_v20 = vsub.f32 %v136_v13, %v137_v17  ;;  %p1172_p0 = scmp.ne.s32.totalorder %s1016_s29, %s1171_s30  ;;  %p1176_p1 = scmp.lt.s32.totalorder %s1016_s29, %s1016_s29 }
   0xa   :  { %v117_v18 = vsub.f32 %v115_v11, %v116_v15  ;;  %v614_v35 = vsub.f32 %v544_v32, %v613_v34  ;;  %p1177_p2 = scmp.lt.s32.totalorder %s1175_s6, %s1171_s30 }
   0xb   :  { %v128_v22 = vand.u32 4294901760, %v127_v19  ;;  %v139_v23 = vand.u32 4294901760, %v138_v20 }
   0xc   :  { %v118_v21 = vand.u32 4294901760, %v117_v18  ;;  %v615_v36 = vand.u32 4294901760, %v614_v35  ;;  %p1178_p3 = por %p1177_p2, %p1176_p1 }
   0xd   :  { %1064 = vmatprep.subr.mxu0 %v139_v23 }
   0xe   :  { %1061 = vmatprep.mubr.f32.mxu0 %v118_v21  ;;  %v616_v42 = vsub.f32 %v614_v35, %v615_v36  ;;  %p1179_p4 = pnand %p1178_p3, %p1172_p0 }
   0xf   :  { %1062 = vmatmul.mubr.f32.vlgmr.msra.gmra.mrb[0].mxu0 %v128_v22 }
  0x10   :  { %1065 = vmatpush3.msra.mxu0 %v139_v23  ;;  %1066 = vmatprep.mubr.f32.mxu0 %v114_v8  ;;  %v617_v48 = vand.u32 4294901760, %v616_v42 }
  0x11   :  { %1069 = vmatprep.subr.mxu0 %v136_v13 }
  0x17   :  { %1067 = vmatmul.mubr.f32.vlgmr.msra.gmra.mrb[0].mxu0 %v124_v9 }
  0x18   :  { %1070 = vmatpush3.msra.mxu0 %v136_v13  ;;  %1071 = vmatprep.mubr.f32.mxu0 %v115_v11 }
  0x19   :  { %1074 = vmatprep.subr.mxu0 %v49_v7 }
  0x1f   :  { %1072 = vmatmul.mubr.f32.vlgmr.msra.gmra.mrb[0].mxu0 %v125_v12 }
  0x20   :  { %1075 = vmatpush3.msra.mxu0 %v49_v7  ;;  %1076 = vmatprep.mubr.f32.mxu0 %v116_v15 }
  0x21   :  { %1079 = vmatprep.subr.mxu0 %v137_v17 }
  0x27   :  { %1077 = vmatmul.mubr.f32.vlgmr.msra.gmra.mrb[0].mxu0 %v126_v16 }
  0x28   :  { %1080 = vmatpush3.msra.mxu0 %v137_v17  ;;  %1081 = vmatprep.mubr.f32.mxu0 %v114_v8 }
  0x29   :  { %1084 = vmatprep.subr.mxu0 %v49_v7 }
  0x2f   :  { %1082 = vmatmul.mubr.f32.vlgmr.msra.gmra.mrb[0].mxu0 %v124_v9 }
  0x30   :  { %1085 = vmatpush3.msra.mxu0 %v49_v7  ;;  %1086 = vmatprep.mubr.f32.mxu0 %v114_v8  ;;  %v1006_v8 = vstv %s1273_s4 }
  0x37   :  { %1087 = vmatmul.mubr.f32.vlgmr.msra.gmra.mrb[0].mxu0 %v124_v9 }
  0x84   :  { %v30_v26 = vpop.permute.xlu0 %29 }
  0x88   :  { %v35_v28 = vpop.permute.xlu0 %34 }
 0x10a   :  { %v1088_v29 = vpop.f32.mrb[0].mxu0 }
 0x10b   :  { %v1149_v30 = vadd.f32 %v1088_v29, %v35_v28  ;;  %v527_v31 = vpop.f32.mrb[1].mxu0 }
 0x10c   :  { %v1150_v33 = vadd.f32 %v527_v31, %v30_v26 }
 0x10d   :  { %1167 = vtanh.f32 %v1149_v30 }
 0x10e   :  { %1169 = vtanh.f32 %v1150_v33 }
 0x117   :  { %v1168_v37 = vpop.eup %1167 }
 0x118   :  { %v1170_v38 = vpop.eup %1169  ;;  %v540_v39 = vsub.f32 %v1149_v30, %v1168_v37 }
 0x119   :  { %v539_v40 = vsub.f32 %v1150_v33, %v1170_v38 }
 0x11a   :  { %v550_v41 = vand.u32 4294901760, %v540_v39 }
 0x11b   :  { %v547_v43 = vand.u32 4294901760, %v539_v40 }
 0x11c   :  { %v632_v44 = vsub.f32 %v540_v39, %v550_v41 }
 0x11d   :  { %v625_v45 = vsub.f32 %v539_v40, %v547_v43  ;;  %v1132_v46 = vpack.c.bf16 %v550_v41, %v547_v43 }
 0x11e   :  { %v633_v47 = vand.u32 4294901760, %v632_v44 }
 0x11f   :  { %v626_v49 = vand.u32 4294901760, %v625_v45  ;;  %1133 = vmatpush3.bf16.msra.mxu1 %v1132_v46  ;;  %v1138_v50 = vpack.c.bf16 %v632_v44, %v625_v45 }
 0x120   :  { %v634_v51 = vsub.f32 %v632_v44, %v633_v47  ;;  %1134 = vmatprep.subr.bf16.mxu1 %v1196_v24 }
 0x121   :  { %v627_v52 = vsub.f32 %v625_v45, %v626_v49  ;;  %v1144_v53 = vpack.c.bf16 %v633_v47, %v626_v49 }
 0x122   :  { %1094 = vmatmul.mubr.f32.vlgmr.msra.gmra.mrb[0].mxu1 %v617_v48  ;;  %v635_v54 = vand.u32 4294901760, %v634_v51 }
 0x123   :  { %v628_v55 = vand.u32 4294901760, %v627_v52  ;;  %1100 = vmatprep.mubr.msk.f32.mxu1 %vm1197_vm2, %v1198_v25 }
 0x125   :  { %v1135_v56 = vpack.c.bf16 %v635_v54, %v628_v55 }
 0x127   :  { %1136 = vmatpush3.bf16.msra.mxu1 %v1135_v56 }
 0x128   :  { %1137 = vmatprep.subr.bf16.mxu1 %v1196_v24 }
 0x12a   :  { %1101 = vmatmul.mubr.f32.vlgmr.msra.gmra.mrb[2].mxu1 %v613_v34 }
 0x12b   :  { %1139 = vmatpush3.bf16.msra.mxu1 %v1138_v50  ;;  %1107 = vmatprep.mubr.msk.f32.mxu1 %vm1197_vm2, %v1198_v25 }
 0x12c   :  { %1140 = vmatprep.subr.bf16.mxu1 %v1196_v24 }
 0x12e   :  { %1108 = vmatmul.mubr.f32.vlgmr.msra.gmra.mrb[4].mxu1 %v614_v35 }
 0x12f   :  { %1142 = vmatpush3.bf16.msra.mxu1 %v1132_v46  ;;  %1114 = vmatprep.mubr.msk.f32.mxu1 %vm1197_vm2, %v1198_v25 }
 0x130   :  { %1143 = vmatprep.subr.bf16.mxu1 %v1196_v24 }
 0x132   :  { %1115 = vmatmul.mubr.f32.vlgmr.msra.gmra.mrb[6].mxu1 %v615_v36 }
 0x133   :  { %1145 = vmatpush3.bf16.msra.mxu1 %v1144_v53  ;;  %1121 = vmatprep.mubr.msk.f32.mxu1 %vm1197_vm2, %v1198_v25 }
 0x134   :  { %1146 = vmatprep.subr.bf16.mxu1 %v1196_v24 }
 0x136   :  { %1122 = vmatmul.mubr.f32.vlgmr.msra.gmra.mrb[8].mxu1 %v613_v34 }
 0x137   :  { %1148 = vmatpush3.bf16.msra.mxu1 %v1132_v46  ;;  %1128 = vmatprep.mubr.msk.f32.mxu1 %vm1197_vm2, %v1198_v25 }
 0x13a   :  { %1129 = vmatmul.mubr.f32.vlgmr.msra.gmra.mrb[10].mxu1 %v613_v34 }
 0x1f5   :  { %v619_v57 = vpop.f32.mrb[0].mxu1 }
 0x1f6   :  { %v1095_v58 = vpop.f32.mrb[1].mxu1 }
 0x1fd   :  { %v700_v59 = vpop.f32.mrb[2].mxu1 }
 0x1fe   :  { %v701_v60 = vadd.f32 %v700_v59, %v619_v57  ;;  %v1102_v61 = vpop.f32.mrb[3].mxu1 }
 0x201   :  { %v776_v62 = vpop.f32.mrb[4].mxu1 }
 0x202   :  { %v777_v63 = vadd.f32 %v776_v62, %v701_v60  ;;  %v1109_v0 = vpop.f32.mrb[5].mxu1 }
 0x205   :  { %v851_v1 = vpop.f32.mrb[6].mxu1 }
 0x206   :  { %v852_v2 = vadd.f32 %v851_v1, %v777_v63  ;;  %v1116_v3 = vpop.f32.mrb[7].mxu1 }
 0x209   :  { %v928_v4 = vpop.f32.mrb[8].mxu1 }
 0x20a   :  { %v929_v5 = vadd.f32 %v928_v4, %v852_v2  ;;  %v1123_v6 = vpop.f32.mrb[9].mxu1 }
 0x20d   :  { %v1001_v7 = vpop.f32.mrb[10].mxu1 }
 0x20e   :  { %v1002_v9 = vadd.f32 %v1001_v7, %v929_v5  ;;  %v1130_v10 = vpop.f32.mrb[11].mxu1 }
 0x210   :  { %v1007_v11 = vadd.f32 %v1006_v8, %v1002_v9 }
 0x212   :  { %1008 = vst [vmem:[#allocation3] sm:$0x1] %v1007_v11 }
 0x213   :  { %1182 = shalt.err (!%p1179_p4)
}
 0x214   :  { %s1183_s9 = scalar_lea.hbm %s1274_s5, 16 }
 0x215   :  { %p1184_p5 = scmp.ne.s32.totalorder %s1274_s5, %s1183_s9  ;;  %p1187_p6 = scmp.lt.u32.totalorder %s1183_s9, %s1274_s5 }
 0x217   :  { %p1189_p7 = pnand %p1187_p6, %p1184_p5 }
 0x219   :  { %1192 = shalt.err (!%p1189_p7)
}
 0x21a   :  { %1018 = dma.vmem_to_hbm [thread:$0]  %s1016_s29, 16, %s1274_s5, [#allocation4]  }
 0x21b   :  { %1193 = dma.done.wait [#allocation4], 16  }
 0x21c   :  { %1194 = vsyncadd [#allocation4], 4294967280 }
 0x21d   :  { %1022 = vsyncpa [#allocation4], 1 }

</bundles_post_ra>
